<compile_context>
chip_gen: v7x
topology: tpu7x:2x2x1
jax: 0.10.0
libtpu: 0.0.40
codegen_flags: <defaults>
</compile_context>

<pallas_src>
import functools

import jax
import jax.numpy as jnp
from jax import lax
from jax.experimental import pallas as pl
from jax.experimental.pallas import tpu as pltpu


def _round_up(x, m):
    return ((x + m - 1) // m) * m


def _pick_images_per_step(n, per_image_bytes, target_bytes=1 << 20):
    """Largest divisor of n keeping per-step bytes <= target while leaving
    >= 2 grid steps (so a 'parallel' grid feeds both v7x TensorCores)."""
    best = 1
    for nb in range(1, n + 1):
        if n % nb:
            continue
        if nb * per_image_bytes > target_bytes:
            break
        if n >= 2 and n // nb < 2:
            continue
        best = nb
    return best


def _cnnblock_kernel(x_ref, w_ref, shift_ref, o_ref, rhs_ref, *,
                     kh_sz, kw_sz, wp, ho, wo, cin):
    """One block of Nb images per grid step.

    x_ref:     (Nb, Cin, LP)      bf16 flattened zero-padded images (row-major
                                  over (Hp, Wp), lane-padded to LP)
    w_ref:     (Cout, K)          bf16 conv weights with BN scale folded in,
                                  K rows ordered (kh, kw, cin)
    shift_ref: (Cout, 1)          f32 folded BN shift (column broadcast)
    o_ref:     (Nb, Cout, Ho*Wo)  f32 output, already NCHW-ordered
    rhs_ref:   (K, Ho*Wp)         bf16 VMEM scratch for the in-kernel im2col
    """
    nb = x_ref.shape[0]
    l_acc = ho * wp                       # padded-width flat output length
    w = w_ref[...]                        # (Cout, K) bf16
    shift = shift_ref[...]                # (Cout, 1) f32

    for b in range(nb):                   # static unroll over images in block
        ximg = x_ref[b]                   # (Cin, LP) bf16

        # In-kernel im2col ("flat-shift" trick): for kernel offset (kh, kw),
        # output position i = ho*Wp + wo needs flat pixel i + kh*Wp + kw, so
        # each K-row group is just a shifted lane-slice of the flat image.
        # All of this stays in VMEM -- nothing 9x-expanded ever touches HBM.
        for kh in range(kh_sz):
            for kw in range(kw_sz):
                off = kh * wp + kw
                g = (kh * kw_sz + kw) * cin
                rhs_ref[g:g + cin, :] = ximg[:, off:off + l_acc]

        # Whole convolution for this image as ONE MXU matmul, bf16 operands,
        # f32 accumulate.  Output orientation (Cout, L) = NCHW-major.
        acc = jnp.dot(w, rhs_ref[...], preferred_element_type=jnp.float32)

        # f32 epilogue: BN shift (lane broadcast) + LeakyReLU(0.1).
        y = acc + shift
        y = jnp.where(y > 0.0, y, 0.1 * y)

        # Crop padded width Wp -> Wo.  These are small VMEM-local copies; the
        # HBM writeback of o_ref stays one dense 256-lane block DMA.
        for r in range(ho):
            o_ref[b, :, r * wo:(r + 1) * wo] = y[:, r * wp:r * wp + wo]


@functools.partial(jax.jit, static_argnames=("padding",))
def cnn_block(x_nchw, w_hwio, bn_scale, bn_shift, *, padding=1):
    """CNNBlock forward. x_nchw: (N, Cin, H, W) f32 -> (N, Cout, H, W) f32."""
    N, Cin, H, W = x_nchw.shape
    KH, KW, _, Cout = w_hwio.shape
    Hp, Wp = H + 2 * padding, W + 2 * padding
    Ho, Wo = Hp - KH + 1, Wp - KW + 1               # stride == 1
    K = KH * KW * Cin
    L = Ho * Wp                                     # padded-width flat length
    # Flat image length so every shifted slice [off, off + L) stays in range.
    LP = _round_up(max(Hp * Wp, (KH - 1) * Wp + (KW - 1) + L), 128)

    # Single fused HBM pass over the input: bf16 cast + spatial zero-pad +
    # flatten + lane-pad.  No NCHW->NHWC transpose and no 9x im2col in HBM.
    xf = jnp.pad(x_nchw.astype(jnp.bfloat16),
                 ((0, 0), (0, 0), (padding, padding), (padding, padding)))
    xf = xf.reshape(N, Cin, Hp * Wp)
    xf = jnp.pad(xf, ((0, 0), (0, 0), (0, LP - Hp * Wp)))

    # Fold BN scale into the conv weights in f32, then cast the MXU operand to
    # bf16.  Row order (kh, kw, cin) matches the in-kernel patch build.
    w_folded = (w_hwio.reshape(K, Cout) * bn_scale[None, :]).T.astype(jnp.bfloat16)
    shift = bn_shift.astype(jnp.float32).reshape(Cout, 1)

    per_image_bytes = Cin * LP * 2 + Cout * Ho * Wo * 4
    NB = _pick_images_per_step(N, per_image_bytes)
    grid = (N // NB,)

    kernel = functools.partial(_cnnblock_kernel, kh_sz=KH, kw_sz=KW, wp=Wp,
                               ho=Ho, wo=Wo, cin=Cin)

    out = pl.pallas_call(
        kernel,
        out_shape=jax.ShapeDtypeStruct((N, Cout, Ho * Wo), x_nchw.dtype),
        grid_spec=pltpu.PrefetchScalarGridSpec(
            num_scalar_prefetch=0,
            grid=grid,
            in_specs=[
                pl.BlockSpec((NB, Cin, LP), lambda n: (n, 0, 0)),
                pl.BlockSpec((Cout, K), lambda n: (0, 0)),
                pl.BlockSpec((Cout, 1), lambda n: (0, 0)),
            ],
            out_specs=pl.BlockSpec((NB, Cout, Ho * Wo), lambda n: (n, 0, 0)),
            scratch_shapes=[pltpu.VMEM((K, L), jnp.bfloat16)],
        ),
        compiler_params=pltpu.CompilerParams(
            dimension_semantics=("parallel",)),
    )(xf, w_folded, shift)

    # (N, Cout, Ho*Wo) is already channel-major: a free metadata reshape gives
    # NCHW.  (The previous version needed an extra HBM transpose pass here.)
    return out.reshape(N, Cout, Ho, Wo)


def reference_cnn_block(x_nchw, w_hwio, bn_scale, bn_shift, *, padding=1):
    """Pure-JAX f32 reference (lax conv) for correctness checking."""
    w_oihw = jnp.transpose(w_hwio, (3, 2, 0, 1))
    y = lax.conv_general_dilated(
        x_nchw, w_oihw, window_strides=(1, 1),
        padding=[(padding, padding), (padding, padding)],
        dimension_numbers=("NCHW", "OIHW", "NCHW"))
    y = y * bn_scale[None, :, None, None] + bn_shift[None, :, None, None]
    return jnp.where(y > 0, y, 0.1 * y)


if __name__ == "__main__":
    # Module config: CNNBlock(in_channels=4, out_channels=8,
    #                         kernel_size=3, stride=1, padding=1)
    N, Cin, H, W = 2, 4, 16, 16
    Cout, KH, KW = 8, 3, 3
    eps = 1e-5

    key = jax.random.PRNGKey(0)
    kx, kw_, kg, kb, km, kv = jax.random.split(key, 6)

    x = jax.random.normal(kx, (N, Cin, H, W), dtype=jnp.float32)

    # Conv weight, PyTorch-like uniform init, stored HWIO.
    fan_in = Cin * KH * KW
    bound = 1.0 / jnp.sqrt(fan_in)
    w_hwio = jax.random.uniform(kw_, (KH, KW, Cin, Cout),
                                minval=-bound, maxval=bound,
                                dtype=jnp.float32)

    # BatchNorm2d parameters / running stats (deterministic, non-trivial).
    gamma = jax.random.uniform(kg, (Cout,), minval=0.5, maxval=1.5,
                               dtype=jnp.float32)
    beta = jax.random.normal(kb, (Cout,), dtype=jnp.float32) * 0.1
    running_mean = jax.random.normal(km, (Cout,), dtype=jnp.float32) * 0.1
    running_var = jax.random.uniform(kv, (Cout,), minval=0.5, maxval=1.5,
                                     dtype=jnp.float32)

    bn_scale = gamma / jnp.sqrt(running_var + eps)
    bn_shift = beta - running_mean * bn_scale

    out = cnn_block(x, w_hwio, bn_scale, bn_shift, padding=1)
    out = jax.block_until_ready(out)

    ref = reference_cnn_block(x, w_hwio, bn_scale, bn_shift, padding=1)
    assert out.shape == (N, Cout, H, W), out.shape
    # bf16 MXU operands (per perf review) -> loosened tolerance vs f32 ref.
    max_err = float(jnp.max(jnp.abs(out - ref)))
    assert jnp.allclose(out, ref, atol=3e-2, rtol=3e-2), max_err

    print("KERNEL_OK")
</pallas_src>

<mosaic_0001>
module attributes {stable_mosaic.version = 11 : i64} {
  func.func @_cnnblock_kernel(%arg0: i32, %arg1: memref<1x4x384xbf16, #tpu.memory_space<vmem>>, %arg2: memref<8x36xbf16, #tpu.memory_space<vmem>>, %arg3: memref<8x1xf32, #tpu.memory_space<vmem>>, %arg4: memref<1x8x256xf32, #tpu.memory_space<vmem>>, %arg5: memref<36x288xbf16, #tpu.memory_space<vmem>>) attributes {dimension_semantics = [#tpu.dimension_semantics<parallel>], iteration_bounds = array<i64: 2>, scalar_prefetch = 0 : i64, scratch_operands = 1 : i64, tpu.core_type = #tpu.core_type<tc>, window_params = [{transform_indices = @transform_0, window_bounds = array<i64: 1, 4, 384>}, {pipeline_mode = #tpu.pipeline_mode<synchronous>, transform_indices = @transform_1, window_bounds = array<i64: 8, 36>}, {pipeline_mode = #tpu.pipeline_mode<synchronous>, transform_indices = @transform_2, window_bounds = array<i64: 8, 1>}, {transform_indices = @transform_3, window_bounds = array<i64: 1, 8, 256>}]} {
    %c0 = arith.constant 0 : index
    %c0_0 = arith.constant 0 : index
    %0 = vector.load %arg2[%c0, %c0_0] : memref<8x36xbf16, #tpu.memory_space<vmem>>, vector<8x36xbf16>
    %c0_1 = arith.constant 0 : index
    %c0_2 = arith.constant 0 : index
    %1 = vector.load %arg3[%c0_1, %c0_2] : memref<8x1xf32, #tpu.memory_space<vmem>>, vector<8x1xf32>
    %c0_3 = arith.constant 0 : index
    %c0_4 = arith.constant 0 : index
    %c0_5 = arith.constant 0 : index
    %2 = vector.load %arg1[%c0_3, %c0_4, %c0_5] : memref<1x4x384xbf16, #tpu.memory_space<vmem>>, vector<1x4x384xbf16>
    %3 = vector.shape_cast %2 : vector<1x4x384xbf16> to vector<4x384xbf16>
    %4 = vector.extract_strided_slice %3 {offsets = [0, 0], sizes = [4, 288], strides = [1, 1]} : vector<4x384xbf16> to vector<4x288xbf16>
    %c0_6 = arith.constant 0 : index
    %c0_7 = arith.constant 0 : index
    %5 = vector.load %arg5[%c0_6, %c0_7] : memref<36x288xbf16, #tpu.memory_space<vmem>>, vector<4x288xbf16>
    tpu.vector_store %arg5[%c0_6, %c0_7], %4 {strides = array<i32>} : memref<36x288xbf16, #tpu.memory_space<vmem>>, vector<4x288xbf16>,
    %6 = vector.extract_strided_slice %3 {offsets = [0, 1], sizes = [4, 288], strides = [1, 1]} : vector<4x384xbf16> to vector<4x288xbf16>
    %c4 = arith.constant 4 : index
    %c0_8 = arith.constant 0 : index
    %7 = vector.load %arg5[%c4, %c0_8] : memref<36x288xbf16, #tpu.memory_space<vmem>>, vector<4x288xbf16>
    tpu.vector_store %arg5[%c4, %c0_8], %6 {strides = array<i32>} : memref<36x288xbf16, #tpu.memory_space<vmem>>, vector<4x288xbf16>,
    %8 = vector.extract_strided_slice %3 {offsets = [0, 2], sizes = [4, 288], strides = [1, 1]} : vector<4x384xbf16> to vector<4x288xbf16>
    %c8 = arith.constant 8 : index
    %c0_9 = arith.constant 0 : index
    %9 = vector.load %arg5[%c8, %c0_9] : memref<36x288xbf16, #tpu.memory_space<vmem>>, vector<4x288xbf16>
    tpu.vector_store %arg5[%c8, %c0_9], %8 {strides = array<i32>} : memref<36x288xbf16, #tpu.memory_space<vmem>>, vector<4x288xbf16>,
    %10 = vector.extract_strided_slice %3 {offsets = [0, 18], sizes = [4, 288], strides = [1, 1]} : vector<4x384xbf16> to vector<4x288xbf16>
    %c12 = arith.constant 12 : index
    %c0_10 = arith.constant 0 : index
    %11 = vector.load %arg5[%c12, %c0_10] : memref<36x288xbf16, #tpu.memory_space<vmem>>, vector<4x288xbf16>
    tpu.vector_store %arg5[%c12, %c0_10], %10 {strides = array<i32>} : memref<36x288xbf16, #tpu.memory_space<vmem>>, vector<4x288xbf16>,
    %12 = vector.extract_strided_slice %3 {offsets = [0, 19], sizes = [4, 288], strides = [1, 1]} : vector<4x384xbf16> to vector<4x288xbf16>
    %c16 = arith.constant 16 : index
    %c0_11 = arith.constant 0 : index
    %13 = vector.load %arg5[%c16, %c0_11] : memref<36x288xbf16, #tpu.memory_space<vmem>>, vector<4x288xbf16>
    tpu.vector_store %arg5[%c16, %c0_11], %12 {strides = array<i32>} : memref<36x288xbf16, #tpu.memory_space<vmem>>, vector<4x288xbf16>,
    %14 = vector.extract_strided_slice %3 {offsets = [0, 20], sizes = [4, 288], strides = [1, 1]} : vector<4x384xbf16> to vector<4x288xbf16>
    %c20 = arith.constant 20 : index
    %c0_12 = arith.constant 0 : index
    %15 = vector.load %arg5[%c20, %c0_12] : memref<36x288xbf16, #tpu.memory_space<vmem>>, vector<4x288xbf16>
    tpu.vector_store %arg5[%c20, %c0_12], %14 {strides = array<i32>} : memref<36x288xbf16, #tpu.memory_space<vmem>>, vector<4x288xbf16>,
    %16 = vector.extract_strided_slice %3 {offsets = [0, 36], sizes = [4, 288], strides = [1, 1]} : vector<4x384xbf16> to vector<4x288xbf16>
    %c24 = arith.constant 24 : index
    %c0_13 = arith.constant 0 : index
    %17 = vector.load %arg5[%c24, %c0_13] : memref<36x288xbf16, #tpu.memory_space<vmem>>, vector<4x288xbf16>
    tpu.vector_store %arg5[%c24, %c0_13], %16 {strides = array<i32>} : memref<36x288xbf16, #tpu.memory_space<vmem>>, vector<4x288xbf16>,
    %18 = vector.extract_strided_slice %3 {offsets = [0, 37], sizes = [4, 288], strides = [1, 1]} : vector<4x384xbf16> to vector<4x288xbf16>
    %c28 = arith.constant 28 : index
    %c0_14 = arith.constant 0 : index
    %19 = vector.load %arg5[%c28, %c0_14] : memref<36x288xbf16, #tpu.memory_space<vmem>>, vector<4x288xbf16>
    tpu.vector_store %arg5[%c28, %c0_14], %18 {strides = array<i32>} : memref<36x288xbf16, #tpu.memory_space<vmem>>, vector<4x288xbf16>,
    %20 = vector.extract_strided_slice %3 {offsets = [0, 38], sizes = [4, 288], strides = [1, 1]} : vector<4x384xbf16> to vector<4x288xbf16>
    %c32 = arith.constant 32 : index
    %c0_15 = arith.constant 0 : index
    %21 = vector.load %arg5[%c32, %c0_15] : memref<36x288xbf16, #tpu.memory_space<vmem>>, vector<4x288xbf16>
    tpu.vector_store %arg5[%c32, %c0_15], %20 {strides = array<i32>} : memref<36x288xbf16, #tpu.memory_space<vmem>>, vector<4x288xbf16>,
    %c0_16 = arith.constant 0 : index
    %c0_17 = arith.constant 0 : index
    %22 = vector.load %arg5[%c0_16, %c0_17] : memref<36x288xbf16, #tpu.memory_space<vmem>>, vector<36x288xbf16>
    %cst = arith.constant dense<0.000000e+00> : vector<8x288xf32>
    %23 = tpu.matmul %0, %22, %cst {dimension_numbers = #tpu.dot_dimension_numbers<[1], [0], [0], [1], [0, 0, 1, 1], [], []>} : vector<8x36xbf16>, vector<36x288xbf16>, vector<8x288xf32> -> vector<8x288xf32>
    %24 = vector.broadcast %1 : vector<8x1xf32> to vector<8x288xf32>
    %25 = arith.addf %23, %24 : vector<8x288xf32>
    %cst_18 = arith.constant 0.000000e+00 : f32
    %26 = vector.broadcast %cst_18 : f32 to vector<8x288xf32>
    %27 = arith.cmpf ogt, %25, %26 : vector<8x288xf32>
    %cst_19 = arith.constant 1.000000e-01 : f32
    %28 = vector.broadcast %cst_19 : f32 to vector<8x288xf32>
    %29 = arith.mulf %28, %25 : vector<8x288xf32>
    %30 = arith.select %27, %25, %29 : vector<8x288xi1>, vector<8x288xf32>
    %31 = vector.extract_strided_slice %30 {offsets = [0, 0], sizes = [8, 16], strides = [1, 1]} : vector<8x288xf32> to vector<8x16xf32>
    %c0_20 = arith.constant 0 : index
    %c0_21 = arith.constant 0 : index
    %c0_22 = arith.constant 0 : index
    %32 = vector.load %arg4[%c0_20, %c0_21, %c0_22] : memref<1x8x256xf32, #tpu.memory_space<vmem>>, vector<1x8x16xf32>
    %33 = vector.shape_cast %32 : vector<1x8x16xf32> to vector<8x16xf32>
    %34 = vector.shape_cast %31 : vector<8x16xf32> to vector<1x8x16xf32>
    tpu.vector_store %arg4[%c0_20, %c0_21, %c0_22], %34 {strides = array<i32>} : memref<1x8x256xf32, #tpu.memory_space<vmem>>, vector<1x8x16xf32>,
    %35 = vector.extract_strided_slice %30 {offsets = [0, 18], sizes = [8, 16], strides = [1, 1]} : vector<8x288xf32> to vector<8x16xf32>
    %c0_23 = arith.constant 0 : index
    %c0_24 = arith.constant 0 : index
    %c16_25 = arith.constant 16 : index
    %36 = vector.load %arg4[%c0_23, %c0_24, %c16_25] : memref<1x8x256xf32, #tpu.memory_space<vmem>>, vector<1x8x16xf32>
    %37 = vector.shape_cast %36 : vector<1x8x16xf32> to vector<8x16xf32>
    %38 = vector.shape_cast %35 : vector<8x16xf32> to vector<1x8x16xf32>
    tpu.vector_store %arg4[%c0_23, %c0_24, %c16_25], %38 {strides = array<i32>} : memref<1x8x256xf32, #tpu.memory_space<vmem>>, vector<1x8x16xf32>,
    %39 = vector.extract_strided_slice %30 {offsets = [0, 36], sizes = [8, 16], strides = [1, 1]} : vector<8x288xf32> to vector<8x16xf32>
    %c0_26 = arith.constant 0 : index
    %c0_27 = arith.constant 0 : index
    %c32_28 = arith.constant 32 : index
    %40 = vector.load %arg4[%c0_26, %c0_27, %c32_28] : memref<1x8x256xf32, #tpu.memory_space<vmem>>, vector<1x8x16xf32>
    %41 = vector.shape_cast %40 : vector<1x8x16xf32> to vector<8x16xf32>
    %42 = vector.shape_cast %39 : vector<8x16xf32> to vector<1x8x16xf32>
    tpu.vector_store %arg4[%c0_26, %c0_27, %c32_28], %42 {strides = array<i32>} : memref<1x8x256xf32, #tpu.memory_space<vmem>>, vector<1x8x16xf32>,
    %43 = vector.extract_strided_slice %30 {offsets = [0, 54], sizes = [8, 16], strides = [1, 1]} : vector<8x288xf32> to vector<8x16xf32>
    %c0_29 = arith.constant 0 : index
    %c0_30 = arith.constant 0 : index
    %c48 = arith.constant 48 : index
    %44 = vector.load %arg4[%c0_29, %c0_30, %c48] : memref<1x8x256xf32, #tpu.memory_space<vmem>>, vector<1x8x16xf32>
    %45 = vector.shape_cast %44 : vector<1x8x16xf32> to vector<8x16xf32>
    %46 = vector.shape_cast %43 : vector<8x16xf32> to vector<1x8x16xf32>
    tpu.vector_store %arg4[%c0_29, %c0_30, %c48], %46 {strides = array<i32>} : memref<1x8x256xf32, #tpu.memory_space<vmem>>, vector<1x8x16xf32>,
    %47 = vector.extract_strided_slice %30 {offsets = [0, 72], sizes = [8, 16], strides = [1, 1]} : vector<8x288xf32> to vector<8x16xf32>
    %c0_31 = arith.constant 0 : index
    %c0_32 = arith.constant 0 : index
    %c64 = arith.constant 64 : index
    %48 = vector.load %arg4[%c0_31, %c0_32, %c64] : memref<1x8x256xf32, #tpu.memory_space<vmem>>, vector<1x8x16xf32>
    %49 = vector.shape_cast %48 : vector<1x8x16xf32> to vector<8x16xf32>
    %50 = vector.shape_cast %47 : vector<8x16xf32> to vector<1x8x16xf32>
    tpu.vector_store %arg4[%c0_31, %c0_32, %c64], %50 {strides = array<i32>} : memref<1x8x256xf32, #tpu.memory_space<vmem>>, vector<1x8x16xf32>,
    %51 = vector.extract_strided_slice %30 {offsets = [0, 90], sizes = [8, 16], strides = [1, 1]} : vector<8x288xf32> to vector<8x16xf32>
    %c0_33 = arith.constant 0 : index
    %c0_34 = arith.constant 0 : index
    %c80 = arith.constant 80 : index
    %52 = vector.load %arg4[%c0_33, %c0_34, %c80] : memref<1x8x256xf32, #tpu.memory_space<vmem>>, vector<1x8x16xf32>
    %53 = vector.shape_cast %52 : vector<1x8x16xf32> to vector<8x16xf32>
    %54 = vector.shape_cast %51 : vector<8x16xf32> to vector<1x8x16xf32>
    tpu.vector_store %arg4[%c0_33, %c0_34, %c80], %54 {strides = array<i32>} : memref<1x8x256xf32, #tpu.memory_space<vmem>>, vector<1x8x16xf32>,
    %55 = vector.extract_strided_slice %30 {offsets = [0, 108], sizes = [8, 16], strides = [1, 1]} : vector<8x288xf32> to vector<8x16xf32>
    %c0_35 = arith.constant 0 : index
    %c0_36 = arith.constant 0 : index
    %c96 = arith.constant 96 : index
    %56 = vector.load %arg4[%c0_35, %c0_36, %c96] : memref<1x8x256xf32, #tpu.memory_space<vmem>>, vector<1x8x16xf32>
    %57 = vector.shape_cast %56 : vector<1x8x16xf32> to vector<8x16xf32>
    %58 = vector.shape_cast %55 : vector<8x16xf32> to vector<1x8x16xf32>
    tpu.vector_store %arg4[%c0_35, %c0_36, %c96], %58 {strides = array<i32>} : memref<1x8x256xf32, #tpu.memory_space<vmem>>, vector<1x8x16xf32>,
    %59 = vector.extract_strided_slice %30 {offsets = [0, 126], sizes = [8, 16], strides = [1, 1]} : vector<8x288xf32> to vector<8x16xf32>
    %c0_37 = arith.constant 0 : index
    %c0_38 = arith.constant 0 : index
    %c112 = arith.constant 112 : index
    %60 = vector.load %arg4[%c0_37, %c0_38, %c112] : memref<1x8x256xf32, #tpu.memory_space<vmem>>, vector<1x8x16xf32>
    %61 = vector.shape_cast %60 : vector<1x8x16xf32> to vector<8x16xf32>
    %62 = vector.shape_cast %59 : vector<8x16xf32> to vector<1x8x16xf32>
    tpu.vector_store %arg4[%c0_37, %c0_38, %c112], %62 {strides = array<i32>} : memref<1x8x256xf32, #tpu.memory_space<vmem>>, vector<1x8x16xf32>,
    %63 = vector.extract_strided_slice %30 {offsets = [0, 144], sizes = [8, 16], strides = [1, 1]} : vector<8x288xf32> to vector<8x16xf32>
    %c0_39 = arith.constant 0 : index
    %c0_40 = arith.constant 0 : index
    %c128 = arith.constant 128 : index
    %64 = vector.load %arg4[%c0_39, %c0_40, %c128] : memref<1x8x256xf32, #tpu.memory_space<vmem>>, vector<1x8x16xf32>
    %65 = vector.shape_cast %64 : vector<1x8x16xf32> to vector<8x16xf32>
    %66 = vector.shape_cast %63 : vector<8x16xf32> to vector<1x8x16xf32>
    tpu.vector_store %arg4[%c0_39, %c0_40, %c128], %66 {strides = array<i32>} : memref<1x8x256xf32, #tpu.memory_space<vmem>>, vector<1x8x16xf32>,
    %67 = vector.extract_strided_slice %30 {offsets = [0, 162], sizes = [8, 16], strides = [1, 1]} : vector<8x288xf32> to vector<8x16xf32>
    %c0_41 = arith.constant 0 : index
    %c0_42 = arith.constant 0 : index
    %c144 = arith.constant 144 : index
    %68 = vector.load %arg4[%c0_41, %c0_42, %c144] : memref<1x8x256xf32, #tpu.memory_space<vmem>>, vector<1x8x16xf32>
    %69 = vector.shape_cast %68 : vector<1x8x16xf32> to vector<8x16xf32>
    %70 = vector.shape_cast %67 : vector<8x16xf32> to vector<1x8x16xf32>
    tpu.vector_store %arg4[%c0_41, %c0_42, %c144], %70 {strides = array<i32>} : memref<1x8x256xf32, #tpu.memory_space<vmem>>, vector<1x8x16xf32>,
    %71 = vector.extract_strided_slice %30 {offsets = [0, 180], sizes = [8, 16], strides = [1, 1]} : vector<8x288xf32> to vector<8x16xf32>
    %c0_43 = arith.constant 0 : index
    %c0_44 = arith.constant 0 : index
    %c160 = arith.constant 160 : index
    %72 = vector.load %arg4[%c0_43, %c0_44, %c160] : memref<1x8x256xf32, #tpu.memory_space<vmem>>, vector<1x8x16xf32>
    %73 = vector.shape_cast %72 : vector<1x8x16xf32> to vector<8x16xf32>
    %74 = vector.shape_cast %71 : vector<8x16xf32> to vector<1x8x16xf32>
    tpu.vector_store %arg4[%c0_43, %c0_44, %c160], %74 {strides = array<i32>} : memref<1x8x256xf32, #tpu.memory_space<vmem>>, vector<1x8x16xf32>,
    %75 = vector.extract_strided_slice %30 {offsets = [0, 198], sizes = [8, 16], strides = [1, 1]} : vector<8x288xf32> to vector<8x16xf32>
    %c0_45 = arith.constant 0 : index
    %c0_46 = arith.constant 0 : index
    %c176 = arith.constant 176 : index
    %76 = vector.load %arg4[%c0_45, %c0_46, %c176] : memref<1x8x256xf32, #tpu.memory_space<vmem>>, vector<1x8x16xf32>
    %77 = vector.shape_cast %76 : vector<1x8x16xf32> to vector<8x16xf32>
    %78 = vector.shape_cast %75 : vector<8x16xf32> to vector<1x8x16xf32>
    tpu.vector_store %arg4[%c0_45, %c0_46, %c176], %78 {strides = array<i32>} : memref<1x8x256xf32, #tpu.memory_space<vmem>>, vector<1x8x16xf32>,
    %79 = vector.extract_strided_slice %30 {offsets = [0, 216], sizes = [8, 16], strides = [1, 1]} : vector<8x288xf32> to vector<8x16xf32>
    %c0_47 = arith.constant 0 : index
    %c0_48 = arith.constant 0 : index
    %c192 = arith.constant 192 : index
    %80 = vector.load %arg4[%c0_47, %c0_48, %c192] : memref<1x8x256xf32, #tpu.memory_space<vmem>>, vector<1x8x16xf32>
    %81 = vector.shape_cast %80 : vector<1x8x16xf32> to vector<8x16xf32>
    %82 = vector.shape_cast %79 : vector<8x16xf32> to vector<1x8x16xf32>
    tpu.vector_store %arg4[%c0_47, %c0_48, %c192], %82 {strides = array<i32>} : memref<1x8x256xf32, #tpu.memory_space<vmem>>, vector<1x8x16xf32>,
    %83 = vector.extract_strided_slice %30 {offsets = [0, 234], sizes = [8, 16], strides = [1, 1]} : vector<8x288xf32> to vector<8x16xf32>
    %c0_49 = arith.constant 0 : index
    %c0_50 = arith.constant 0 : index
    %c208 = arith.constant 208 : index
    %84 = vector.load %arg4[%c0_49, %c0_50, %c208] : memref<1x8x256xf32, #tpu.memory_space<vmem>>, vector<1x8x16xf32>
    %85 = vector.shape_cast %84 : vector<1x8x16xf32> to vector<8x16xf32>
    %86 = vector.shape_cast %83 : vector<8x16xf32> to vector<1x8x16xf32>
    tpu.vector_store %arg4[%c0_49, %c0_50, %c208], %86 {strides = array<i32>} : memref<1x8x256xf32, #tpu.memory_space<vmem>>, vector<1x8x16xf32>,
    %87 = vector.extract_strided_slice %30 {offsets = [0, 252], sizes = [8, 16], strides = [1, 1]} : vector<8x288xf32> to vector<8x16xf32>
    %c0_51 = arith.constant 0 : index
    %c0_52 = arith.constant 0 : index
    %c224 = arith.constant 224 : index
    %88 = vector.load %arg4[%c0_51, %c0_52, %c224] : memref<1x8x256xf32, #tpu.memory_space<vmem>>, vector<1x8x16xf32>
    %89 = vector.shape_cast %88 : vector<1x8x16xf32> to vector<8x16xf32>
    %90 = vector.shape_cast %87 : vector<8x16xf32> to vector<1x8x16xf32>
    tpu.vector_store %arg4[%c0_51, %c0_52, %c224], %90 {strides = array<i32>} : memref<1x8x256xf32, #tpu.memory_space<vmem>>, vector<1x8x16xf32>,
    %91 = vector.extract_strided_slice %30 {offsets = [0, 270], sizes = [8, 16], strides = [1, 1]} : vector<8x288xf32> to vector<8x16xf32>
    %c0_53 = arith.constant 0 : index
    %c0_54 = arith.constant 0 : index
    %c240 = arith.constant 240 : index
    %92 = vector.load %arg4[%c0_53, %c0_54, %c240] : memref<1x8x256xf32, #tpu.memory_space<vmem>>, vector<1x8x16xf32>
    %93 = vector.shape_cast %92 : vector<1x8x16xf32> to vector<8x16xf32>
    %94 = vector.shape_cast %91 : vector<8x16xf32> to vector<1x8x16xf32>
    tpu.vector_store %arg4[%c0_53, %c0_54, %c240], %94 {strides = array<i32>} : memref<1x8x256xf32, #tpu.memory_space<vmem>>, vector<1x8x16xf32>,
    return
  }
  func.func @transform_0(%arg0: i32) -> (i32, i32, i32) {
    %c0_i32 = arith.constant 0 : i32
    %c0_i32_0 = arith.constant 0 : i32
    %c0_i32_1 = arith.constant 0 : i32
    return %arg0, %c0_i32, %c0_i32_0 : i32, i32, i32
  }
  func.func @transform_1(%arg0: i32) -> (i32, i32) {
    %c0_i32 = arith.constant 0 : i32
    %c0_i32_0 = arith.constant 0 : i32
    %c0_i32_1 = arith.constant 0 : i32
    return %c0_i32, %c0_i32_0 : i32, i32
  }
  func.func @transform_2(%arg0: i32) -> (i32, i32) {
    %c0_i32 = arith.constant 0 : i32
    %c0_i32_0 = arith.constant 0 : i32
    %c0_i32_1 = arith.constant 0 : i32
    return %c0_i32, %c0_i32_0 : i32, i32
  }
  func.func @transform_3(%arg0: i32) -> (i32, i32, i32) {
    %c0_i32 = arith.constant 0 : i32
    %c0_i32_0 = arith.constant 0 : i32
    %c0_i32_1 = arith.constant 0 : i32
    return %arg0, %c0_i32, %c0_i32_0 : i32, i32, i32
  }
}

</mosaic_0001>

<bundles_post_ra>
// kernel: cnn_block.1
= control target key start
LH: loop header
LB: loop body
LE: loop exit
PB: predicated region body
PF: predicated region fallthrough
CT: control target
= control target key end

     0   :  { %s739_s12 = smov 0   ;;  %s830_s0 = inlined_call_operand.vmem [shape: bf16[2,4,384], index: 0, kind: input, shape index: {}]   ;;  %s831_s1 = inlined_call_operand.vmem [shape: bf16[8,36], index: 1, kind: input, shape index: {}]   ;;  %s832_s2 = inlined_call_operand.vmem [shape: f32[8,1], index: 2, kind: input, shape index: {}]   ;;  %s833_s3 = inlined_call_operand.vmem [shape: f32[2,8,256], index: 3, kind: output, shape index: {}]  }
   0x1 LB: > { %s604_s13 = sadd.s32 4294967295, %s693_s12   ;;  %p608_p0 = scmp.ge.s32.totalorder %s693_s12, 1  ;;  %s693_s12 = sphi %s739_s12, %s13_s12  }
   0x2   : > { %p137_p1 = scmp.lt.s32.totalorder %s693_s12, 3 }
   0x4   : > { %p138_p2 = pnand %p608_p0, %p137_p1 }
   0x5   : > { %p161_p3 = scmp.lt.s32.totalorder (!%p138_p2), %s604_s13, 1  ;;  %v180_v0 = vlaneseq (!%p138_p2)  ;;  %v695_v1 = vmov (!%p138_p2), 1983009808   ;;  %vm194_vm0 = vcmask (!%p138_p2), 254976   ;;  %s696_s18 = smov (!%p138_p2), 126   ;;  %v698_v11 = vmov (!%p138_p2), 0.0  }
   0x6   : > { %141 = sbr.rel (%p138_p2) target bundleno = 547 (0x223), region = 32  ;;  %v178_v2 = vunpack.c.l.s4 (!%p138_p2), %v695_v1  ;;  %s697_s19 = smov (!%p138_p2), 127   ;;  %632 = vmatprep.subr.bf16.mxu1 (!%p138_p2), %v698_v11  ;;  %vm704_vm1 = vmmov (!%p138_p2), 0   ;;  %v706_v13 = vmov (!%p138_p2), 0   ;;  %v173_v14 = vld [vmem:[%s832_s2] sm:$0xff] (!%p138_p2)  ;;  %vm217_vm2 = vcmask (!%p138_p2), 257026  }
   0x7   : > { %v181_v3 = vshrl.u32 (!%p138_p2), %v180_v0, 7  ;;  %s699_s20 = smov (!%p138_p2), 110   ;;  %s700_s21 = smov (!%p138_p2), 109   ;;  %638 = vmatprep.mubr.msk.bf16.mxu1 (!%p138_p2), %vm704_vm1, %v698_v11  ;;  %411 = vmatprep.mubr.bf16.mxu0 (!%p138_p2), %v706_v13  ;;  %vm210_vm3 = vcmask (!%p138_p2), 1043456   ;;  %vm212_vm4 = vcmask (!%p138_p2), 1039360   ;;  %vm226_vm5 = vcmask (!%p138_p2), 1031168  }
   0x8   : > { %v179_v4 = vunpack.c.0.s8 (!%p138_p2), %v178_v2  ;;  %s701_s22 = smov (!%p138_p2), 108   ;;  %s702_s23 = smov (!%p138_p2), 92   ;;  %675 = vset.pattern.permute.xlu0 (!%p138_p2), %v706_v13  ;;  %vm239_vm6 = vcmask (!%p138_p2), 900096   ;;  %vm252_vm7 = vcmask (!%p138_p2), 891904   ;;  %vm265_vm8 = vcmask (!%p138_p2), 883712  }
   0x9   : > { %s703_s24 = smov (!%p138_p2), 91   ;;  %s705_s25 = smov (!%p138_p2), 90   ;;  %vm278_vm9 = vcmask (!%p138_p2), 752640   ;;  %vm291_vm10 = vcmask (!%p138_p2), 744448   ;;  %vm304_vm11 = vcmask (!%p138_p2), 736256   ;;  %vm369_vm12 = vcmask (!%p138_p2), 1041408  }
   0xa   : > { %v182_v5 = vsub.s32 (!%p138_p2), %v179_v4, %v181_v3  ;;  %vm365_vm13 = vcmask (!%p138_p2), 293888   ;;  %s707_s4 = smov (!%p138_p2), 100   ;;  %s708_s8 = smov (!%p138_p2), 114  }
   0xb   : > { %s709_s9 = smov (!%p138_p2), 124   ;;  %s710_s10 = smov (!%p138_p2), 122  }
   0xc   : > { %s711_s11 = smov (!%p138_p2), 120   ;;  %s714_s15 = smov (!%p138_p2), 104  }
   0xd   : > { %s835_s13 = smov (!%p161_p3, %s604_s13), 1  ;;  %s715_s16 = smov 116  }
   0xe   : > { %s642_s14 = smul.u32 6, %s835_s13  ;;  %s627_s30 = sshll.u32 %s835_s13, 4 }
   0xf   : > { %s791_s7 = scalar_lea.vmem %s833_s3, %s627_s30  ;;  %s712_s13 = smov 106  }
  0x10   : > { %s165_s17 = scalar_lea.vmem %s830_s0, %s642_s14  ;;  %s713_s14 = smov 118  }
  0x11   : > { %v174_v6 = vld [vmem:[%s165_s17] sm:$0x3f]  ;;  %s716_s17 = smov 102  }
  0x12   : > { %v183_v7 = vrot.slane %v174_v6, %v182_v5  ;;  %612 = vst.sshfl [vmem:[#allocation2] sm:$0xf pattern:$0x76325410] %v174_v6  ;;  %v176_v8 = vcombine.high %v174_v6, %v174_v6  ;;  %v196_v9 = vcombine.low %v174_v6, %v174_v6 }
  0x14   : > { %219 = vrot.lane.b32.xlu1 %v183_v7, %s696_s18  ;;  %206 = vrot.lane.b32.xlu0 %v183_v7, %s697_s19  ;;  %v190_v10 = vrot.slane %v176_v8, %v182_v5  ;;  %v203_v12 = vrot.slane %v196_v9, %v182_v5  ;;  %v172_v8 = vld [vmem:[%s831_s1] sm:$0xf] }
  0x16   : > { %195 = vst.msk [vmem:[#allocation2 + $0x8] sm:$0x3] %vm194_vm0, %v190_v10 }
  0x18   : > { %234 = vrot.lane.b32.xlu1 %v183_v7, %s699_s20  ;;  %245 = vrot.lane.b32.xlu0 %v183_v7, %s700_s21 }
  0x1c   : > { %204 = vrot.lane.b32.xlu0 %v203_v12, %s697_s19  ;;  %221 = vrot.lane.b32.xlu1 %v190_v10, %s696_s18  ;;  %s718_s19 = smov 98  }
  0x20   : > { %232 = vrot.lane.b32.xlu0 %v203_v12, %s699_s20  ;;  %247 = vrot.lane.b32.xlu1 %v190_v10, %s700_s21 }
  0x24   : > { %258 = vrot.lane.b32.xlu0 %v203_v12, %s701_s22  ;;  %260 = vrot.lane.b32.xlu1 %v183_v7, %s701_s22 }
  0x28   : > { %271 = vrot.lane.b32.xlu0 %v183_v7, %s702_s23  ;;  %273 = vrot.lane.b32.xlu1 %v190_v10, %s702_s23 }
  0x2c   : > { %284 = vrot.lane.b32.xlu0 %v203_v12, %s703_s24  ;;  %286 = vrot.lane.b32.xlu1 %v183_v7, %s703_s24 }
  0x30   : > { %297 = vrot.lane.b32.xlu0 %v183_v7, %s705_s25  ;;  %299 = vrot.lane.b32.xlu1 %v190_v10, %s705_s25 }
  0x34   : > { %322 = vperm.xlu0 %675, %v173_v14  }
  0x86   : > { %v220_v15 = vpop.permute.xlu1 %219  ;;  %v207_v16 = vpop.permute.xlu0 %206 }
  0x87   : > { %218 = vst.msk [vmem:[#allocation2 + $0x8] sm:$0xc] %vm217_vm2, %v207_v16  ;;  %v223_v21 = vrot.slane %v220_v15, 4  ;;  %v209_v22 = vrot.slane %v207_v16, 4 }
  0x8a   : > { %v235_v17 = vpop.permute.xlu1 %234  ;;  %v246_v18 = vpop.permute.xlu0 %245 }
  0x8b   : > { %244 = vst.msk [vmem:[#allocation2 + $0x14] sm:$0xc] %vm217_vm2, %v235_v17  ;;  %v237_v31 = vrot.slane %v235_v17, 4  ;;  %v249_v32 = vrot.slane %v246_v18, 4 }
  0x8e   : > { %v205_v19 = vpop.permute.xlu0 %204  ;;  %v222_v20 = vpop.permute.xlu1 %221 }
  0x8f   : > { %v208_v23 = vrot.slane %v205_v19, 4  ;;  %v224_v24 = vrot.slane %v222_v20, 4  ;;  %231 = vst.msk [vmem:[#allocation2 + $0x14] sm:$0x3] %vm194_vm0, %v222_v20 }
  0x91   : > { %v211_v25 = vsel %vm210_vm3, %v208_v23, %v209_v22  ;;  %v225_v26 = vsel %vm210_vm3, %v223_v21, %v224_v24 }
  0x92   : > { %v213_v27 = vsel %vm212_vm4, %v205_v19, %v211_v25  ;;  %v227_v28 = vsel %vm226_vm5, %v220_v15, %v225_v26  ;;  %v233_v29 = vpop.permute.xlu0 %232  ;;  %v248_v30 = vpop.permute.xlu1 %247  ;;  %vm485_vm4 = vcmask 523648   ;;  %vm490_vm5 = vcmask 654848  }
  0x93   : > { %216 = vst [vmem:[#allocation2] sm:$0xcc] %v213_v27  ;;  %230 = vst [vmem:[#allocation2 + $0xc] sm:$0x33] %v227_v28  ;;  %v236_v33 = vrot.slane %v233_v29, 4  ;;  %v250_v34 = vrot.slane %v248_v30, 4 }
  0x94   : > { %257 = vst.msk [vmem:[#allocation2 + $0x20] sm:$0x3] %vm194_vm0, %v248_v30 }
  0x95   : > { %v238_v35 = vsel %vm210_vm3, %v236_v33, %v237_v31  ;;  %v251_v36 = vsel %vm210_vm3, %v249_v32, %v250_v34 }
  0x96   : > { %v240_v37 = vsel %vm239_vm6, %v233_v29, %v238_v35  ;;  %v253_v38 = vsel %vm252_vm7, %v246_v18, %v251_v36  ;;  %v259_v39 = vpop.permute.xlu0 %258  ;;  %v261_v40 = vpop.permute.xlu1 %260  ;;  %v676_v41 = vld [vmem:[#allocation2 + $0x8] ss:$12 sps:$4 sm:$0xff]   ;;  %vm495_vm6 = vcmask 786048   ;;  %vm500_vm7 = vcmask 917248  }
  0x97   : > { %243 = vst [vmem:[#allocation2 + $0xc] sm:$0xcc] %v240_v37  ;;  %256 = vst [vmem:[#allocation2 + $0x18] sm:$0x33] %v253_v38  ;;  %v262_v42 = vrot.slane %v259_v39, 4  ;;  %v263_v43 = vrot.slane %v261_v40, 4  ;;  %633 = vmatpush3.bf16.msra.mxu1 %v676_v41 }
  0x98   : > { %270 = vst.msk [vmem:[#allocation2 + $0x20] sm:$0xc] %vm217_vm2, %v261_v40  ;;  %634 = vmatprep.subr.bf16.mxu1 %v698_v11 }
  0x99   : > { %v264_v44 = vsel %vm210_vm3, %v262_v42, %v263_v43 }
  0x9a   : > { %v266_v45 = vsel %vm265_vm8, %v259_v39, %v264_v44  ;;  %v272_v46 = vpop.permute.xlu0 %271  ;;  %v274_v47 = vpop.permute.xlu1 %273  ;;  %vm541_vm8 = vcmask 818176  }
  0x9b   : > { %269 = vst [vmem:[#allocation2 + $0x18] sm:$0xcc] %v266_v45  ;;  %v275_v48 = vrot.slane %v272_v46, 4  ;;  %v276_v49 = vrot.slane %v274_v47, 4  ;;  %283 = vst.msk [vmem:[#allocation2 + $0x2c] sm:$0x3] %vm194_vm0, %v274_v47 }
  0x9d   : > { %v277_v50 = vsel %vm210_vm3, %v275_v48, %v276_v49 }
  0x9e   : > { %v279_v51 = vsel %vm278_vm9, %v272_v46, %v277_v50  ;;  %v285_v52 = vpop.permute.xlu0 %284  ;;  %v287_v53 = vpop.permute.xlu1 %286  ;;  %v677_v54 = vld [vmem:[#allocation2 + $0x4] ss:$12 sps:$4 sm:$0xff]   ;;  %v679_v55 = vld [vmem:[#allocation2] ss:$12 sps:$4 sm:$0xff]   ;;  %vm510_vm9 = vcmask 1048448  }
  0x9f   : > { %282 = vst [vmem:[#allocation2 + $0x24] sm:$0x33] %v279_v51  ;;  %v288_v56 = vrot.slane %v285_v52, 4  ;;  %v289_v57 = vrot.slane %v287_v53, 4  ;;  %296 = vst.msk [vmem:[#allocation2 + $0x2c] sm:$0xc] %vm217_vm2, %v287_v53  ;;  %379 = vmatprep.subr.bf16.mxu0 %v677_v54 }
  0xa0   : > { %380 = vmatpush1.bf16.msra.mxu0 %v679_v55  ;;  %vm475_vm2 = vcmask 261248  }
  0xa1   : > { %v290_v58 = vsel %vm210_vm3, %v288_v56, %v289_v57 }
  0xa2   : > { %v292_v59 = vsel %vm291_vm10, %v285_v52, %v290_v58  ;;  %v298_v60 = vpop.permute.xlu0 %297  ;;  %v300_v61 = vpop.permute.xlu1 %299  ;;  %vm507_vm10 = vcmask 932864  }
  0xa3   : > { %295 = vst [vmem:[#allocation2 + $0x24] sm:$0xcc] %v292_v59  ;;  %v301_v62 = vrot.slane %v298_v60, 4  ;;  %v302_v63 = vrot.slane %v300_v61, 4  ;;  %309 = vst.msk [vmem:[#allocation2 + $0x38] sm:$0x3] %vm194_vm0, %v300_v61 }
  0xa4   : > { %vm469_vm0 = vcmask 130048  }
  0xa5   : > { %v303_v0 = vsel %vm210_vm3, %v301_v62, %v302_v63  ;;  %vm480_vm3 = vcmask 392448  }
  0xa6   : > { %v305_v1 = vsel %vm304_vm11, %v298_v60, %v303_v0  ;;  %v680_v2 = vld [vmem:[#allocation2 + $0x20] ss:$12 sps:$4 sm:$0xff]  }
  0xa7   : > { %308 = vst [vmem:[#allocation2 + $0x30] sm:$0x33] %v305_v1  ;;  %635 = vmatpush3.bf16.msra.mxu1 %v680_v2 }
  0xa8   : > { %636 = vmatprep.subr.bf16.mxu1 %v698_v11 }
  0xaa   : > { %v681_v3 = vld [vmem:[#allocation2 + $0x1c] ss:$12 sps:$4 sm:$0xff]   ;;  %v683_v4 = vld [vmem:[#allocation2 + $0x18] ss:$12 sps:$4 sm:$0xff]  }
  0xab   : > { %v684_v5 = vld [vmem:[#allocation2 + $0x38] ss:$0 sps:$4 sm:$0x33]   ;;  %381 = vmatprep.subr.bf16.mxu0 %v681_v3 }
  0xac   : > { %382 = vmatpush1.bf16.msra.mxu0 %v683_v4  ;;  %v377_v6 = vsel %vm369_vm12, %v684_v5, 0 }
  0xad   : > { %637 = vmatpush3.bf16.msra.mxu1 %v377_v6 }
  0xae   : > { %v318_v7 = vld [vmem:[#allocation2 + $0x30] sm:$0x33] }
  0xaf   : > { %v620_v9 = vcombine.high %v318_v7, %v318_v7  ;;  %v619_v10 = vcombine.low %v318_v7, %v318_v7 }
  0xb0   : > { %639 = vmatmul.mubr.msk.bf16.vlgmr.msra.gmra.mrb[0].mxu1 %vm365_vm13, %v172_v8 }
  0xb1   : > { %622 = vmatprep.subr.msk.bf16.mxu0 %vm369_vm12, %v620_v9  ;;  %v371_v11 = vsel %vm369_vm12, %v619_v10, 0 }
  0xb2   : > { %384 = vmatpush1.bf16.msra.mxu0 %v371_v11 }
  0xb3   : > { %v323_v12 = vpop.permute.xlu0 %322 }
  0xb5   : > { %623 = vmatmul.mubr.msk.bf16.vlgmr.msra.gmra.mrb[0].mxu0 %vm365_vm13, %v172_v8 }
 0x183   : > { %v454_v13 = vpop.f32.mrb[0].mxu1 }
 0x184   : > { %v455_v14 = vadd.f32 %v454_v13, %v323_v12  ;;  %v640_v15 = vpop.f32.mrb[1].mxu1 }
 0x185   : > { %v457_v16 = vpop.f32.mrb[2].mxu1 }
 0x186   : > { %v465_v17 = vmul.f32 0.1, %v455_v14  ;;  %vm462_vm14 = vcmp.gt.f32.partialorder %v455_v14, 0.0  ;;  %v641_v18 = vpop.f32.mrb[3].mxu1 }
 0x188   : > { %v413_v19 = vpop.f32.mrb[0].mxu0  ;;  %v468_v22 = vsel %vm462_vm14, %v455_v14, %v465_v17 }
 0x189   : > { %v414_v20 = vadd.f32 %v413_v19, %v323_v12  ;;  %v415_v21 = vpop.f32.mrb[1].mxu0  ;;  %539 = vrot.lane.b32.xlu0 %v468_v22, %s707_s4 }
 0x18a   : > { %v416_v23 = vadd.f32 %v415_v21, %v323_v12  ;;  %v417_v24 = vpop.f32.mrb[2].mxu0 }
 0x18b   : > { %vm460_vm15 = vcmp.gt.f32.partialorder %v414_v20, 0.0  ;;  %v463_v25 = vmul.f32 0.1, %v414_v20  ;;  %v418_v26 = vpop.f32.mrb[3].mxu0 }
 0x18c   : > { %v464_v28 = vmul.f32 0.1, %v416_v23  ;;  %vm461_vm1 = vcmp.gt.f32.partialorder %v416_v23, 0.0 }
 0x18d   : > { %v466_v27 = vsel %vm460_vm15, %v414_v20, %v463_v25 }
 0x18e   : > { %472 = vrot.lane.b32.xlu1 %v466_v27, %s696_s18  ;;  %503 = vrot.lane.b32.xlu0 %v466_v27, %s708_s8  ;;  %470 = vst.msk [vmem:[%s791_s7] sm:$0xff] %vm469_vm0, %v466_v27  ;;  %v467_v29 = vsel %vm461_vm1, %v416_v23, %v464_v28  ;;  %s717_s18 = smov 112  }
 0x192   : > { %477 = vrot.lane.b32.xlu1 %v466_v27, %s709_s9  ;;  %516 = vrot.lane.b32.xlu0 %v467_v29, %s699_s20 }
 0x196   : > { %482 = vrot.lane.b32.xlu1 %v466_v27, %s710_s10  ;;  %520 = vrot.lane.b32.xlu0 %v467_v29, %s701_s22 }
 0x19a   : > { %487 = vrot.lane.b32.xlu1 %v466_v27, %s711_s11  ;;  %524 = vrot.lane.b32.xlu0 %v467_v29, %s712_s13 }
 0x19e   : > { %492 = vrot.lane.b32.xlu1 %v466_v27, %s713_s14  ;;  %528 = vrot.lane.b32.xlu0 %v467_v29, %s714_s15 }
 0x1a2   : > { %497 = vrot.lane.b32.xlu1 %v466_v27, %s715_s16  ;;  %532 = vrot.lane.b32.xlu0 %v467_v29, %s716_s17 }
 0x1a6   : > { %512 = vrot.lane.b32.xlu1 %v467_v29, %s717_s18  ;;  %545 = vrot.lane.b32.xlu0 %v468_v22, %s718_s19 }
 0x1aa   : > { %537 = vrot.lane.b32.xlu1 %v467_v29, %s707_s4 }
 0x1ae   : > { %505 = vrot.lane.b32.xlu1 %v467_v29, %s708_s8 }
 0x1fb   : > { %v540_v30 = vpop.permute.xlu0 %539 }
 0x200   : > { %v473_v31 = vpop.permute.xlu1 %472  ;;  %v504_v32 = vpop.permute.xlu0 %503 }
 0x201   : > { %476 = vst.msk [vmem:[%s791_s7] sm:$0xff] %vm475_vm2, %v473_v31 }
 0x204   : > { %v478_v33 = vpop.permute.xlu1 %477  ;;  %v517_v34 = vpop.permute.xlu0 %516 }
 0x205   : > { %481 = vst.msk [vmem:[%s791_s7] sm:$0xff] %vm480_vm3, %v478_v33 }
 0x208   : > { %v483_v35 = vpop.permute.xlu1 %482  ;;  %v521_v36 = vpop.permute.xlu0 %520 }
 0x209   : > { %486 = vst.msk [vmem:[%s791_s7] sm:$0xff] %vm485_vm4, %v483_v35 }
 0x20c   : > { %v488_v37 = vpop.permute.xlu1 %487  ;;  %v525_v38 = vpop.permute.xlu0 %524 }
 0x20d   : > { %491 = vst.msk [vmem:[%s791_s7] sm:$0xff] %vm490_vm5, %v488_v37 }
 0x210   : > { %v493_v39 = vpop.permute.xlu1 %492  ;;  %v529_v40 = vpop.permute.xlu0 %528 }
 0x211   : > { %496 = vst.msk [vmem:[%s791_s7] sm:$0xff] %vm495_vm6, %v493_v39 }
 0x214   : > { %v498_v41 = vpop.permute.xlu1 %497  ;;  %v533_v43 = vpop.permute.xlu0 %532 }
 0x215   : > { %501 = vst.msk [vmem:[%s791_s7] sm:$0xff] %vm500_vm7, %v498_v41 }
 0x218   : > { %v513_v42 = vpop.permute.xlu1 %512  ;;  %v546_v46 = vpop.permute.xlu0 %545 }
 0x219   : > { %515 = vst.msk [vmem:[%s791_s7 + $0x8] sm:$0xff] %vm469_vm0, %v513_v42 }
 0x21a   : > { %519 = vst.msk [vmem:[%s791_s7 + $0x8] sm:$0xff] %vm475_vm2, %v517_v34 }
 0x21b   : > { %523 = vst.msk [vmem:[%s791_s7 + $0x8] sm:$0xff] %vm480_vm3, %v521_v36 }
 0x21c   : > { %527 = vst.msk [vmem:[%s791_s7 + $0x8] sm:$0xff] %vm485_vm4, %v525_v38  ;;  %v538_v44 = vpop.permute.xlu1 %537 }
 0x21d   : > { %531 = vst.msk [vmem:[%s791_s7 + $0x8] sm:$0xff] %vm490_vm5, %v529_v40  ;;  %v542_v45 = vsel %vm541_vm8, %v538_v44, %v540_v30 }
 0x21e   : > { %535 = vst.msk [vmem:[%s791_s7 + $0x8] sm:$0xff] %vm495_vm6, %v533_v43 }
 0x21f   : > { %544 = vst.msk [vmem:[%s791_s7 + $0x8] sm:$0xff] %vm500_vm7, %v542_v45 }
 0x220   : > { %548 = vst.msk [vmem:[%s791_s7 + $0x8] sm:$0xff] %vm510_vm9, %v546_v46  ;;  %v506_v47 = vpop.permute.xlu1 %505 }
 0x221   : > { %v508_v48 = vsel %vm507_vm10, %v504_v32, %v506_v47 }
 0x222   : > { %511 = vst.msk [vmem:[%s791_s7] sm:$0xff] %vm510_vm9, %v508_v48 }
 0x223 PF: > { %s13_s12 = sadd.s32 1, %s693_s12  }
 0x224   : > { %p10_p4 = scmp.ge.s32.totalorder %s13_s12, 4  }
 0x226   :  { %12 = sbr.rel (!%p10_p4) target bundleno = 1 (0x1), region = 62 }

</bundles_post_ra>
